<compile_context>
chip_gen: v7x
topology: tpu7x:2x2x1
jax: 0.10.0
libtpu: 0.0.40
codegen_flags: <defaults>
</compile_context>

<pallas_src>
from typing import NamedTuple

import jax
import jax.numpy as jnp
from jax.experimental import pallas as pl
from jax.experimental.pallas import tpu as pltpu

_LANE = 128
_SUBLANE_BF16 = 16                       # bf16 min tile is (16, 128)
_INTERNAL_SCRATCH = 2 * 1024 * 1024      # allowance for Mosaic-internal scratch


def _round_up(x, m):
    return (x + m - 1) // m * m


# ---------------------------------------------------------------------------
# kernels
# ---------------------------------------------------------------------------
def _resident_kernel(x_ref, w1_ref, b1_ref, w2_ref, b2_ref, o_ref):
    """Whole weight matrices resident in VMEM; one batch tile per grid step."""
    h = jnp.dot(x_ref[...], w1_ref[...], preferred_element_type=jnp.float32)
    h = jnp.maximum(h + b1_ref[...], 0.0)                  # bias + ReLU in f32
    y = jnp.dot(h.astype(w2_ref.dtype), w2_ref[...],
                preferred_element_type=jnp.float32)
    o_ref[...] = (y + b2_ref[...]).astype(o_ref.dtype)


def _tiled_kernel(x_ref, w1_ref, b1_ref, w2_ref, b2_ref, o_ref, acc_ref):
    """Hidden-dim-tiled fallback: weights streamed in (Dp,th)/(th,Dp) slabs,
    f32 accumulator in VMEM scratch across the hidden ("arbitrary") axis."""
    hi = pl.program_id(1)

    @pl.when(hi == 0)
    def _():
        acc_ref[...] = jnp.broadcast_to(b2_ref[...], acc_ref.shape)

    h = jnp.dot(x_ref[...], w1_ref[...], preferred_element_type=jnp.float32)
    h = jnp.maximum(h + b1_ref[...], 0.0)
    acc_ref[...] += jnp.dot(h.astype(w2_ref.dtype), w2_ref[...],
                            preferred_element_type=jnp.float32)

    @pl.when(hi == pl.num_programs(1) - 1)
    def _():
        o_ref[...] = acc_ref[...].astype(o_ref.dtype)


# ---------------------------------------------------------------------------
# parameter preparation (pad/cast once, hoisted out of the per-call path)
# ---------------------------------------------------------------------------
class AutoEncoderParams(NamedTuple):
    w1: jax.Array   # (Dp, Hp) mxu_dtype
    b1: jax.Array   # (1, Hp)  f32
    w2: jax.Array   # (Hp, Dp) mxu_dtype
    b2: jax.Array   # (1, Dp)  f32
    D: int
    H: int


def prepare_params(w1, b1, w2, b2, mxu_dtype=jnp.bfloat16):
    """Pad feature dims to multiples of 128 and cast weights to the MXU dtype.
    w1: [D, H], b1: [H]/[1,H], w2: [H, D], b2: [D]/[1,D]  ([in, out] layout)."""
    D, H = w1.shape
    Dp, Hp = _round_up(D, _LANE), _round_up(H, _LANE)
    b1 = jnp.asarray(b1).reshape(1, H)
    b2 = jnp.asarray(b2).reshape(1, D)

    def pad(a, shape, dtype):
        if a.shape == shape:
            return a.astype(dtype)
        return jnp.zeros(shape, dtype).at[: a.shape[0], : a.shape[1]].set(
            a.astype(dtype))

    return AutoEncoderParams(
        w1=pad(w1, (Dp, Hp), mxu_dtype),
        b1=pad(b1, (1, Hp), jnp.float32),
        w2=pad(w2, (Hp, Dp), mxu_dtype),
        b2=pad(b2, (1, Dp), jnp.float32),
        D=D, H=H)


# ---------------------------------------------------------------------------
# VMEM accounting / tile selection
# ---------------------------------------------------------------------------
def _vmem_budget():
    cap = None
    try:
        cap = getattr(pltpu.get_tpu_info(), "vmem_capacity_bytes", None)
    except Exception:
        cap = None
    if not cap or cap <= 0:
        cap = 64 * 1024 * 1024          # conservative: v7x per-TensorCore VMEM
    budget = (cap * 3) // 4             # what our own tiles may use
    limit = (cap * 9) // 10             # scoped-VMEM limit for the compiler
    return int(budget), int(limit)


def _resident_bytes(tb, Dp, Hp, in_b, out_b):
    # weights counted double-buffered: conservative, still correct even if the
    # Buffered(1) request is rejected and we fall back to default buffering.
    w = 2 * (Dp * Hp + Hp * Dp) * in_b + 2 * (Hp + Dp) * 4
    io = 2 * tb * Dp * in_b + 2 * tb * Dp * out_b
    tmp = tb * Hp * 4 + tb * Dp * 4                 # f32 h and pre-cast y
    return w + io + tmp + _INTERNAL_SCRATCH


def _tiled_bytes(tb, th, Dp, in_b, out_b):
    w = 2 * (Dp * th + th * Dp) * in_b + 2 * th * 4 + 2 * Dp * 4
    io = 2 * tb * Dp * in_b + 2 * tb * Dp * out_b
    tmp = tb * th * 4 + tb * Dp * 4                 # f32 h and partial product
    acc = tb * Dp * 4                               # accumulator scratch
    return w + io + tmp + acc + _INTERNAL_SCRATCH


def _batch_tile_candidates(B, max_batch_tile):
    exact = _round_up(B, _SUBLANE_BF16)
    cands = {16, 32, 64, 128, 256, 512, 1024, 2048, exact}
    cands = [c for c in cands if c <= max_batch_tile and c <= exact]
    if not cands:
        cands = [min(exact, _round_up(max(max_batch_tile, 1), _SUBLANE_BF16))]
    return sorted(cands, reverse=True)


def _maybe_split_for_two_cores(tb, B):
    # Ensure >=2 grid steps (when the batch allows) so the "parallel" batch
    # axis can shard across v7x's 2 TensorCores; one extra step (~0.35 us) is
    # negligible on single-TC v5e/v6e.
    if B >= 2 * _SUBLANE_BF16 and _round_up(B, tb) // tb < 2:
        tb = min(tb, _round_up(-(-B // 2), _SUBLANE_BF16))
    return tb


# ---------------------------------------------------------------------------
# pallas_call wrappers
# ---------------------------------------------------------------------------
def _call_resident(xp, p, tb, Bp, Dp, Hp, out_dtype, vmem_limit):
    def build(resident_mode):
        kw = {} if resident_mode is None else {"pipeline_mode": resident_mode}
        return pl.pallas_call(
            _resident_kernel,
            out_shape=jax.ShapeDtypeStruct((Bp, Dp), out_dtype),
            grid=(Bp // tb,),
            in_specs=[
                pl.BlockSpec((tb, Dp), lambda i: (i, 0)),        # x: streamed
                pl.BlockSpec((Dp, Hp), lambda i: (0, 0), **kw),  # W1 resident
                pl.BlockSpec((1, Hp), lambda i: (0, 0), **kw),   # b1 resident
                pl.BlockSpec((Hp, Dp), lambda i: (0, 0), **kw),  # W2 resident
                pl.BlockSpec((1, Dp), lambda i: (0, 0), **kw),   # b2 resident
            ],
            out_specs=pl.BlockSpec((tb, Dp), lambda i: (i, 0)),
            compiler_params=pltpu.CompilerParams(
                dimension_semantics=("parallel",),
                vmem_limit_bytes=vmem_limit),
        )

    args = (xp, p.w1, p.b1, p.w2, p.b2)
    try:
        # constant index_map -> DMA'd once; a second buffer is pure waste
        return build(pl.Buffered(buffer_count=1))(*args)
    except Exception:
        # this jax version rejects single-buffering; use default buffering
        return build(None)(*args)


def _call_tiled(xp, p, tb, th, Bp, Dp, Hp, out_dtype, vmem_limit):
    return pl.pallas_call(
        _tiled_kernel,
        out_shape=jax.ShapeDtypeStruct((Bp, Dp), out_dtype),
        grid=(Bp // tb, Hp // th),
        in_specs=[
            pl.BlockSpec((tb, Dp), lambda i, h: (i, 0)),   # x reused across h
            pl.BlockSpec((Dp, th), lambda i, h: (0, h)),   # W1 column slab
            pl.BlockSpec((1, th), lambda i, h: (0, h)),    # b1 slab
            pl.BlockSpec((th, Dp), lambda i, h: (h, 0)),   # W2 row slab
            pl.BlockSpec((1, Dp), lambda i, h: (0, 0)),    # b2
        ],
        out_specs=pl.BlockSpec((tb, Dp), lambda i, h: (i, 0)),
        scratch_shapes=[pltpu.VMEM((tb, Dp), jnp.float32)],
        compiler_params=pltpu.CompilerParams(
            dimension_semantics=("parallel", "arbitrary"),
            vmem_limit_bytes=vmem_limit),
    )(xp, p.w1, p.b1, p.w2, p.b2)


# ---------------------------------------------------------------------------
# public forward
# ---------------------------------------------------------------------------
def autoencoder_forward(x, params, *, out_dtype=None, max_batch_tile=2048,
                        force_weight_tiling=False):
    """Forward of Linear(D->H) -> ReLU -> Linear(H->D) with prepared params."""
    B, D = x.shape
    assert D == params.D, (D, params.D)
    mxu_dtype = params.w1.dtype
    Dp, Hp = params.w1.shape
    out_dtype = jnp.dtype(x.dtype if out_dtype is None else out_dtype)
    in_b = jnp.dtype(mxu_dtype).itemsize
    out_b = out_dtype.itemsize

    budget, vmem_limit = _vmem_budget()
    cands = _batch_tile_candidates(B, max_batch_tile)

    tb, th = None, None
    if not force_weight_tiling:
        for c in cands:
            if _resident_bytes(c, Dp, Hp, in_b, out_b) <= budget:
                tb = c
                break
    if tb is None:
        # weights do not fit residently (or tiling forced): tile the hidden dim
        th_cands = [t for t in (1024, 512, 256, 128) if Hp % t == 0]
        for c in cands:
            for t in th_cands:
                if _tiled_bytes(c, t, Dp, in_b, out_b) <= budget:
                    tb, th = c, t
                    break
            if tb is not None:
                break
        if tb is None:
            # TODO(synk): also tile the feature dim D for very large models.
            raise NotImplementedError(
                "autoencoder too large for VMEM even with hidden-dim tiling")

    tb = _maybe_split_for_two_cores(tb, B)
    Bp = _round_up(B, tb)

    # pad / cast x only when actually needed (each is an extra HBM pass)
    aligned = (Bp == B) and (Dp == D)
    if aligned:
        xp = x if x.dtype == mxu_dtype else x.astype(mxu_dtype)
    else:
        xp = jnp.zeros((Bp, Dp), mxu_dtype).at[:B, :D].set(x.astype(mxu_dtype))

    if th is None:
        out_padded = _call_resident(xp, params, tb, Bp, Dp, Hp, out_dtype,
                                    vmem_limit)
    else:
        out_padded = _call_tiled(xp, params, tb, th, Bp, Dp, Hp, out_dtype,
                                 vmem_limit)

    return out_padded if aligned else out_padded[:B, :D]


# ---------------------------------------------------------------------------
# reference / init (PyTorch-style) and smoke test
# ---------------------------------------------------------------------------
def init_params(key, input_dims, hidden_dims, dtype=jnp.float32):
    """PyTorch Linear init: U(-1/sqrt(fan_in), 1/sqrt(fan_in)); weights stored
    transposed ([in, out]) relative to nn.Linear."""
    k1, k2, k3, k4 = jax.random.split(key, 4)
    bound1 = 1.0 / jnp.sqrt(float(input_dims))
    bound2 = 1.0 / jnp.sqrt(float(hidden_dims))
    w1 = jax.random.uniform(k1, (input_dims, hidden_dims), dtype,
                            minval=-bound1, maxval=bound1)
    b1 = jax.random.uniform(k2, (1, hidden_dims), dtype,
                            minval=-bound1, maxval=bound1)
    w2 = jax.random.uniform(k3, (hidden_dims, input_dims), dtype,
                            minval=-bound2, maxval=bound2)
    b2 = jax.random.uniform(k4, (1, input_dims), dtype,
                            minval=-bound2, maxval=bound2)
    return w1, b1, w2, b2


def reference_forward(x, w1, b1, w2, b2):
    h = jnp.maximum(x @ w1 + b1, 0.0)
    return h @ w2 + b2


if __name__ == "__main__":
    # TODO(synk): only the forward pass is implemented; MSELoss / SGD training
    # step from AutoEncoderModel are host-side and not part of this kernel.
    batch = 8
    input_dims = 64
    hidden_dims = 32

    key = jax.random.PRNGKey(0)
    kx, kp = jax.random.split(key)
    x = jax.random.normal(kx, (batch, input_dims), jnp.float32)
    w1, b1, w2, b2 = init_params(kp, input_dims, hidden_dims)

    params = prepare_params(w1, b1, w2, b2)   # pad/cast once, reused per call

    out = autoencoder_forward(x, params)
    out = jax.block_until_ready(out)
    ref = reference_forward(x, w1, b1, w2, b2)
    assert out.shape == (batch, input_dims)
    err = float(jnp.max(jnp.abs(out - ref)))
    # bf16 MXU operands -> loosened tolerance vs. the f32 reference
    assert jnp.allclose(out, ref, atol=2e-2, rtol=2e-2), err

    # also exercise the hidden-dim-tiled fallback (used when weights outgrow
    # VMEM, e.g. large models on v7x's 64 MiB per-TC VMEM)
    out_tiled = autoencoder_forward(x, params, force_weight_tiling=True)
    out_tiled = jax.block_until_ready(out_tiled)
    err_t = float(jnp.max(jnp.abs(out_tiled - ref)))
    assert jnp.allclose(out_tiled, ref, atol=2e-2, rtol=2e-2), err_t

    print("KERNEL_OK")
</pallas_src>

<mosaic_0001>
module attributes {stable_mosaic.version = 11 : i64} {
  func.func @_resident_kernel(%arg0: i32, %arg1: memref<16x128xbf16, #tpu.memory_space<vmem>>, %arg2: memref<128x128xbf16, #tpu.memory_space<vmem>>, %arg3: memref<1x128xf32, #tpu.memory_space<vmem>>, %arg4: memref<128x128xbf16, #tpu.memory_space<vmem>>, %arg5: memref<1x128xf32, #tpu.memory_space<vmem>>, %arg6: memref<16x128xf32, #tpu.memory_space<vmem>>) attributes {dimension_semantics = [#tpu.dimension_semantics<parallel>], iteration_bounds = array<i64: 1>, scalar_prefetch = 0 : i64, scratch_operands = 0 : i64, tpu.core_type = #tpu.core_type<tc>, window_params = [{transform_indices = @transform_0, window_bounds = array<i64: 16, 128>}, {pipeline_mode = #tpu.pipeline_mode<synchronous>, transform_indices = @transform_1, window_bounds = array<i64: 128, 128>}, {pipeline_mode = #tpu.pipeline_mode<synchronous>, transform_indices = @transform_2, window_bounds = array<i64: 1, 128>}, {pipeline_mode = #tpu.pipeline_mode<synchronous>, transform_indices = @transform_3, window_bounds = array<i64: 128, 128>}, {pipeline_mode = #tpu.pipeline_mode<synchronous>, transform_indices = @transform_4, window_bounds = array<i64: 1, 128>}, {transform_indices = @transform_5, window_bounds = array<i64: 16, 128>}]} {
    %c0 = arith.constant 0 : index
    %c0_0 = arith.constant 0 : index
    %0 = vector.load %arg1[%c0, %c0_0] : memref<16x128xbf16, #tpu.memory_space<vmem>>, vector<16x128xbf16>
    %c0_1 = arith.constant 0 : index
    %c0_2 = arith.constant 0 : index
    %1 = vector.load %arg2[%c0_1, %c0_2] : memref<128x128xbf16, #tpu.memory_space<vmem>>, vector<128x128xbf16>
    %cst = arith.constant dense<0.000000e+00> : vector<16x128xf32>
    %2 = tpu.matmul %0, %1, %cst {dimension_numbers = #tpu.dot_dimension_numbers<[1], [0], [0], [1], [0, 0, 1, 1], [], []>} : vector<16x128xbf16>, vector<128x128xbf16>, vector<16x128xf32> -> vector<16x128xf32>
    %c0_3 = arith.constant 0 : index
    %c0_4 = arith.constant 0 : index
    %3 = vector.load %arg3[%c0_3, %c0_4] : memref<1x128xf32, #tpu.memory_space<vmem>>, vector<1x128xf32>
    %4 = vector.broadcast %3 : vector<1x128xf32> to vector<16x128xf32>
    %5 = arith.addf %2, %4 : vector<16x128xf32>
    %cst_5 = arith.constant 0.000000e+00 : f32
    %6 = vector.broadcast %cst_5 : f32 to vector<16x128xf32>
    %7 = arith.maximumf %5, %6 : vector<16x128xf32>
    %8 = arith.truncf %7 : vector<16x128xf32> to vector<16x128xbf16>
    %c0_6 = arith.constant 0 : index
    %c0_7 = arith.constant 0 : index
    %9 = vector.load %arg4[%c0_6, %c0_7] : memref<128x128xbf16, #tpu.memory_space<vmem>>, vector<128x128xbf16>
    %cst_8 = arith.constant dense<0.000000e+00> : vector<16x128xf32>
    %10 = tpu.matmul %8, %9, %cst_8 {dimension_numbers = #tpu.dot_dimension_numbers<[1], [0], [0], [1], [0, 0, 1, 1], [], []>} : vector<16x128xbf16>, vector<128x128xbf16>, vector<16x128xf32> -> vector<16x128xf32>
    %c0_9 = arith.constant 0 : index
    %c0_10 = arith.constant 0 : index
    %11 = vector.load %arg5[%c0_9, %c0_10] : memref<1x128xf32, #tpu.memory_space<vmem>>, vector<1x128xf32>
    %12 = vector.broadcast %11 : vector<1x128xf32> to vector<16x128xf32>
    %13 = arith.addf %10, %12 : vector<16x128xf32>
    %c0_11 = arith.constant 0 : index
    %c0_12 = arith.constant 0 : index
    %14 = vector.load %arg6[%c0_11, %c0_12] : memref<16x128xf32, #tpu.memory_space<vmem>>, vector<16x128xf32>
    tpu.vector_store %arg6[%c0_11, %c0_12], %13 {strides = array<i32>} : memref<16x128xf32, #tpu.memory_space<vmem>>, vector<16x128xf32>,
    return
  }
  func.func @transform_0(%arg0: i32) -> (i32, i32) {
    %c0_i32 = arith.constant 0 : i32
    %c0_i32_0 = arith.constant 0 : i32
    return %arg0, %c0_i32 : i32, i32
  }
  func.func @transform_1(%arg0: i32) -> (i32, i32) {
    %c0_i32 = arith.constant 0 : i32
    %c0_i32_0 = arith.constant 0 : i32
    %c0_i32_1 = arith.constant 0 : i32
    return %c0_i32, %c0_i32_0 : i32, i32
  }
  func.func @transform_2(%arg0: i32) -> (i32, i32) {
    %c0_i32 = arith.constant 0 : i32
    %c0_i32_0 = arith.constant 0 : i32
    %c0_i32_1 = arith.constant 0 : i32
    return %c0_i32, %c0_i32_0 : i32, i32
  }
  func.func @transform_3(%arg0: i32) -> (i32, i32) {
    %c0_i32 = arith.constant 0 : i32
    %c0_i32_0 = arith.constant 0 : i32
    %c0_i32_1 = arith.constant 0 : i32
    return %c0_i32, %c0_i32_0 : i32, i32
  }
  func.func @transform_4(%arg0: i32) -> (i32, i32) {
    %c0_i32 = arith.constant 0 : i32
    %c0_i32_0 = arith.constant 0 : i32
    %c0_i32_1 = arith.constant 0 : i32
    return %c0_i32, %c0_i32_0 : i32, i32
  }
  func.func @transform_5(%arg0: i32) -> (i32, i32) {
    %c0_i32 = arith.constant 0 : i32
    %c0_i32_0 = arith.constant 0 : i32
    return %arg0, %c0_i32 : i32, i32
  }
}

module attributes {stable_mosaic.version = 11 : i64} {
  func.func @_resident_kernel(%arg0: i32, %arg1: memref<16x128xbf16, #tpu.memory_space<vmem>>, %arg2: memref<128x128xbf16, #tpu.memory_space<vmem>>, %arg3: memref<1x128xf32, #tpu.memory_space<vmem>>, %arg4: memref<128x128xbf16, #tpu.memory_space<vmem>>, %arg5: memref<1x128xf32, #tpu.memory_space<vmem>>, %arg6: memref<16x128xf32, #tpu.memory_space<vmem>>) attributes {dimension_semantics = [#tpu.dimension_semantics<parallel>], iteration_bounds = array<i64: 1>, scalar_prefetch = 0 : i64, scratch_operands = 0 : i64, tpu.core_type = #tpu.core_type<tc>, window_params = [{transform_indices = @transform_0, window_bounds = array<i64: 16, 128>}, {pipeline_mode = #tpu.pipeline_mode<synchronous>, transform_indices = @transform_1, window_bounds = array<i64: 128, 128>}, {pipeline_mode = #tpu.pipeline_mode<synchronous>, transform_indices = @transform_2, window_bounds = array<i64: 1, 128>}, {pipeline_mode = #tpu.pipeline_mode<synchronous>, transform_indices = @transform_3, window_bounds = array<i64: 128, 128>}, {pipeline_mode = #tpu.pipeline_mode<synchronous>, transform_indices = @transform_4, window_bounds = array<i64: 1, 128>}, {transform_indices = @transform_5, window_bounds = array<i64: 16, 128>}]} {
    %c0 = arith.constant 0 : index
    %c0_0 = arith.constant 0 : index
    %0 = vector.load %arg1[%c0, %c0_0] : memref<16x128xbf16, #tpu.memory_space<vmem>>, vector<16x128xbf16>
    %c0_1 = arith.constant 0 : index
    %c0_2 = arith.constant 0 : index
    %1 = vector.load %arg2[%c0_1, %c0_2] : memref<128x128xbf16, #tpu.memory_space<vmem>>, vector<128x128xbf16>
    %cst = arith.constant dense<0.000000e+00> : vector<16x128xf32>
    %2 = tpu.matmul %0, %1, %cst {dimension_numbers = #tpu.dot_dimension_numbers<[1], [0], [0], [1], [0, 0, 1, 1], [], []>} : vector<16x128xbf16>, vector<128x128xbf16>, vector<16x128xf32> -> vector<16x128xf32>
    %c0_3 = arith.constant 0 : index
    %c0_4 = arith.constant 0 : index
    %3 = vector.load %arg3[%c0_3, %c0_4] : memref<1x128xf32, #tpu.memory_space<vmem>>, vector<1x128xf32>
    %4 = vector.broadcast %3 : vector<1x128xf32> to vector<16x128xf32>
    %5 = arith.addf %2, %4 : vector<16x128xf32>
    %cst_5 = arith.constant 0.000000e+00 : f32
    %6 = vector.broadcast %cst_5 : f32 to vector<16x128xf32>
    %7 = arith.maximumf %5, %6 : vector<16x128xf32>
    %8 = arith.truncf %7 : vector<16x128xf32> to vector<16x128xbf16>
    %c0_6 = arith.constant 0 : index
    %c0_7 = arith.constant 0 : index
    %9 = vector.load %arg4[%c0_6, %c0_7] : memref<128x128xbf16, #tpu.memory_space<vmem>>, vector<128x128xbf16>
    %cst_8 = arith.constant dense<0.000000e+00> : vector<16x128xf32>
    %10 = tpu.matmul %8, %9, %cst_8 {dimension_numbers = #tpu.dot_dimension_numbers<[1], [0], [0], [1], [0, 0, 1, 1], [], []>} : vector<16x128xbf16>, vector<128x128xbf16>, vector<16x128xf32> -> vector<16x128xf32>
    %c0_9 = arith.constant 0 : index
    %c0_10 = arith.constant 0 : index
    %11 = vector.load %arg5[%c0_9, %c0_10] : memref<1x128xf32, #tpu.memory_space<vmem>>, vector<1x128xf32>
    %12 = vector.broadcast %11 : vector<1x128xf32> to vector<16x128xf32>
    %13 = arith.addf %10, %12 : vector<16x128xf32>
    %c0_11 = arith.constant 0 : index
    %c0_12 = arith.constant 0 : index
    %14 = vector.load %arg6[%c0_11, %c0_12] : memref<16x128xf32, #tpu.memory_space<vmem>>, vector<16x128xf32>
    tpu.vector_store %arg6[%c0_11, %c0_12], %13 {strides = array<i32>} : memref<16x128xf32, #tpu.memory_space<vmem>>, vector<16x128xf32>,
    return
  }
  func.func @transform_0(%arg0: i32) -> (i32, i32) {
    %c0_i32 = arith.constant 0 : i32
    %c0_i32_0 = arith.constant 0 : i32
    return %arg0, %c0_i32 : i32, i32
  }
  func.func @transform_1(%arg0: i32) -> (i32, i32) {
    %c0_i32 = arith.constant 0 : i32
    %c0_i32_0 = arith.constant 0 : i32
    %c0_i32_1 = arith.constant 0 : i32
    return %c0_i32, %c0_i32_0 : i32, i32
  }
  func.func @transform_2(%arg0: i32) -> (i32, i32) {
    %c0_i32 = arith.constant 0 : i32
    %c0_i32_0 = arith.constant 0 : i32
    %c0_i32_1 = arith.constant 0 : i32
    return %c0_i32, %c0_i32_0 : i32, i32
  }
  func.func @transform_3(%arg0: i32) -> (i32, i32) {
    %c0_i32 = arith.constant 0 : i32
    %c0_i32_0 = arith.constant 0 : i32
    %c0_i32_1 = arith.constant 0 : i32
    return %c0_i32, %c0_i32_0 : i32, i32
  }
  func.func @transform_4(%arg0: i32) -> (i32, i32) {
    %c0_i32 = arith.constant 0 : i32
    %c0_i32_0 = arith.constant 0 : i32
    %c0_i32_1 = arith.constant 0 : i32
    return %c0_i32, %c0_i32_0 : i32, i32
  }
  func.func @transform_5(%arg0: i32) -> (i32, i32) {
    %c0_i32 = arith.constant 0 : i32
    %c0_i32_0 = arith.constant 0 : i32
    return %arg0, %c0_i32 : i32, i32
  }
}

</mosaic_0001>

<bundles_post_ra>
// kernel: tpu_custom_call.1
= control target key start
LH: loop header
LB: loop body
LE: loop exit
PB: predicated region body
PF: predicated region fallthrough
CT: control target
= control target key end

     0   :  { %10 = vsyncpa [#allocation3], 0  ;;  %s626_s0 = inlined_call_operand.hbm [shape: bf16[16,128], index: 0, kind: input, shape index: {}]   ;;  %s627_s1 = inlined_call_operand.hbm [shape: bf16[128,128], index: 1, kind: input, shape index: {}]   ;;  %s628_s2 = inlined_call_operand.vmem [shape: f32[1,128], index: 2, kind: input, shape index: {}]   ;;  %s629_s3 = inlined_call_operand.hbm [shape: bf16[128,128], index: 3, kind: input, shape index: {}]   ;;  %s630_s4 = inlined_call_operand.vmem [shape: f32[1,128], index: 4, kind: input, shape index: {}]   ;;  %s631_s5 = inlined_call_operand.hbm [shape: f32[16,128], index: 5, kind: output, shape index: {}]  }
   0x1   :  { %11 = vsyncpa [#allocation6], 0 }
   0x2   :  { %12 = vsyncpa [#allocation4], 0  ;;  %s516_s18 = smov [#allocation5]   ;;  %s517_s20 = smov [#allocation2]  }
   0x3   :  { %s30_s19 = sshll.u32 %s516_s18, 4  ;;  %s18_s21 = sshll.u32 %s517_s20, 4  ;;  %s31_s19 = int_to_ptr.vmem [resolvable:$true] %s30_s19  ;;  %s556_s21 = int_to_ptr.vmem [resolvable:$true] %s18_s21 }
   0x4   :  { %s422_s24 = scalar_lea.hbm %s627_s1, 1024 }
   0x5   :  { %p423_p0 = scmp.ne.s32.totalorder %s627_s1, %s422_s24  ;;  %p426_p1 = scmp.lt.u32.totalorder %s422_s24, %s627_s1 }
   0x7   :  { %p428_p2 = pnand %p426_p1, %p423_p0 }
   0x9   :  { %431 = shalt.err (!%p428_p2)
}
   0xa   :  { %s432_s29 = scalar_lea.vmem %s31_s19, 1024  ;;  %p437_p4 = scmp.lt.s32.totalorder %s31_s19, %s31_s19 }
   0xb   :  { %p433_p3 = scmp.ne.s32.totalorder %s31_s19, %s432_s29  ;;  %p438_p5 = scmp.lt.s32.totalorder %s432_s29, %s432_s29 }
   0xd   :  { %p439_p6 = por %p438_p5, %p437_p4 }
   0xf   :  { %p440_p7 = pnand %p439_p6, %p433_p3 }
  0x11   :  { %443 = shalt.err (!%p440_p7)
}
  0x12   :  { %s518_s30 = smov 64   ;;  %s519_s6 = smov 4  }
  0x13   :  { %36 = dma.hbm_to_vmem [thread:$0]  %s627_s1, 1024, %s31_s19, [#allocation6], %s518_s30, %s518_s30, %s519_s6  }
  0x14   :  { %s444_s11 = scalar_lea.hbm %s626_s0, 128 }
  0x15   :  { %p445_p8 = scmp.ne.s32.totalorder %s626_s0, %s444_s11  ;;  %p448_p9 = scmp.lt.u32.totalorder %s444_s11, %s626_s0 }
  0x17   :  { %p450_p10 = pnand %p448_p9, %p445_p8 }
  0x19   :  { %453 = shalt.err (!%p450_p10)
}
  0x1a   :  { %s454_s16 = scalar_lea.vmem %s556_s21, 128  ;;  %p459_p12 = scmp.lt.s32.totalorder %s556_s21, %s556_s21 }
  0x1b   :  { %p455_p11 = scmp.ne.s32.totalorder %s556_s21, %s454_s16  ;;  %p460_p13 = scmp.lt.s32.totalorder %s454_s16, %s454_s16 }
  0x1d   :  { %p461_p0 = por %p460_p13, %p459_p12 }
  0x1f   :  { %p462_p1 = pnand %p461_p0, %p455_p11 }
  0x21   :  { %465 = shalt.err (!%p462_p1)
}
  0x22   :  { %24 = dma.hbm_to_vmem [thread:$0]  %s626_s0, 128, %s556_s21, [#allocation3], %s518_s30, %s518_s30, %s519_s6  }
  0x23   :  { %s520_s18 = smov [#allocation7]   ;;  %s466_s23 = scalar_lea.hbm %s629_s3, 1024 }
  0x24   :  { %s44_s19 = sshll.u32 %s520_s18, 4  ;;  %p467_p2 = scmp.ne.s32.totalorder %s629_s3, %s466_s23  ;;  %s45_s19 = int_to_ptr.vmem [resolvable:$true] %s44_s19 }
  0x25   :  { %p470_p3 = scmp.lt.u32.totalorder %s466_s23, %s629_s3 }
  0x27   :  { %p472_p4 = pnand %p470_p3, %p467_p2 }
  0x29   :  { %475 = shalt.err (!%p472_p4)
}
  0x2a   :  { %s476_s28 = scalar_lea.vmem %s45_s19, 1024  ;;  %p481_p6 = scmp.lt.s32.totalorder %s45_s19, %s45_s19 }
  0x2b   :  { %p477_p5 = scmp.ne.s32.totalorder %s45_s19, %s476_s28  ;;  %p482_p7 = scmp.lt.s32.totalorder %s476_s28, %s476_s28 }
  0x2d   :  { %p483_p8 = por %p482_p7, %p481_p6 }
  0x2f   :  { %p484_p9 = pnand %p483_p8, %p477_p5 }
  0x31   :  { %487 = shalt.err (!%p484_p9)
}
  0x32   :  { %50 = dma.hbm_to_vmem [thread:$0]  %s629_s3, 1024, %s45_s19, [#allocation6], %s518_s30, %s518_s30, %s519_s6  }
  0x33   :  { %510 = dma.done.wait [#allocation3], 128  }
  0x34   :  { %511 = vsyncadd [#allocation3], 4294967168 }
  0x35   :  { %512 = dma.done.wait [#allocation6], 2048  }
  0x36   :  { %513 = vsyncadd [#allocation6], 4294965248  ;;  %v521_v0 = vmov 0.0   ;;  %vm522_vm0 = vmmov 0   ;;  %v405_v1 = vld [vmem:[#allocation5] sm:$0xff]   ;;  %v406_v2 = vld [vmem:[#allocation5 + $0x8] sm:$0xff]  }
  0x37   :  { %355 = vmatprep.subr.bf16.mxu0 %v521_v0  ;;  %371 = vmatprep.mubr.msk.bf16.mxu0 %vm522_vm0, %v521_v0  ;;  %v407_v3 = vld [vmem:[#allocation5 + $0x10] sm:$0xff]   ;;  %v414_v4 = vld [vmem:[#allocation7] sm:$0xff]   ;;  %v408_v5 = vld [vmem:[#allocation5 + $0x18] sm:$0xff]   ;;  %s523_s7 = smov [#allocation8]  }
  0x38   :  { %375 = vmatprep.subr.bf16.mxu1 %v521_v0  ;;  %391 = vmatprep.mubr.msk.bf16.mxu1 %vm522_vm0, %v521_v0  ;;  %v415_v6 = vld [vmem:[#allocation7 + $0x8] sm:$0xff]   ;;  %v409_v7 = vld [vmem:[#allocation5 + $0x20] sm:$0xff]   ;;  %v416_v8 = vld [vmem:[#allocation7 + $0x10] sm:$0xff]   ;;  %s305_s8 = sshll.u32 %s523_s7, 4  ;;  %s306_s8 = int_to_ptr.vmem [resolvable:$true] %s305_s8 }
  0x39   :  { %356 = vmatpush3.bf16.msra.mxu0 %v405_v1  ;;  %376 = vmatpush3.bf16.msra.mxu1 %v414_v4  ;;  %v410_v9 = vld [vmem:[#allocation5 + $0x28] sm:$0xff]   ;;  %v417_v10 = vld [vmem:[#allocation7 + $0x18] sm:$0xff]   ;;  %v411_v11 = vld [vmem:[#allocation5 + $0x30] sm:$0xff]   ;;  %p493_p11 = scmp.lt.s32.totalorder %s306_s8, %s306_s8 }
  0x3a   :  { %357 = vmatprep.subr.bf16.mxu0 %v521_v0  ;;  %377 = vmatprep.subr.bf16.mxu1 %v521_v0  ;;  %v418_v12 = vld [vmem:[#allocation7 + $0x20] sm:$0xff]   ;;  %v412_v13 = vld [vmem:[#allocation5 + $0x38] sm:$0xff]   ;;  %v419_v14 = vld [vmem:[#allocation7 + $0x28] sm:$0xff]  }
  0x3b   :  { %v413_v15 = vld [vmem:[#allocation2] sm:$0xff]   ;;  %v420_v16 = vld [vmem:[#allocation7 + $0x30] sm:$0xff]  }
  0x3c   :  { %v421_v17 = vld [vmem:[#allocation7 + $0x38] sm:$0xff]  }
  0x3d   :  { %358 = vmatpush3.bf16.msra.mxu0 %v406_v2  ;;  %378 = vmatpush3.bf16.msra.mxu1 %v415_v6  ;;  %v318_v18 = vld [vmem:[%s628_s2] ss:$0 sm:$0xff]  ;;  %s488_s2 = scalar_lea.vmem %s306_s8, 256 }
  0x3e   :  { %359 = vmatprep.subr.bf16.mxu0 %v521_v0  ;;  %379 = vmatprep.subr.bf16.mxu1 %v521_v0  ;;  %v328_v28 = vld [vmem:[%s630_s4] ss:$0 sm:$0xff]  ;;  %p489_p10 = scmp.ne.s32.totalorder %s306_s8, %s488_s2  ;;  %p494_p12 = scmp.lt.s32.totalorder %s488_s2, %s488_s2 }
  0x40   :  { %p495_p13 = por %p494_p12, %p493_p11 }
  0x41   :  { %360 = vmatpush3.bf16.msra.mxu0 %v407_v3  ;;  %380 = vmatpush3.bf16.msra.mxu1 %v416_v8 }
  0x42   :  { %361 = vmatprep.subr.bf16.mxu0 %v521_v0  ;;  %381 = vmatprep.subr.bf16.mxu1 %v521_v0  ;;  %p496_p0 = pnand %p495_p13, %p489_p10 }
  0x45   :  { %362 = vmatpush3.bf16.msra.mxu0 %v408_v5  ;;  %382 = vmatpush3.bf16.msra.mxu1 %v417_v10 }
  0x46   :  { %363 = vmatprep.subr.bf16.mxu0 %v521_v0  ;;  %383 = vmatprep.subr.bf16.mxu1 %v521_v0 }
  0x49   :  { %364 = vmatpush3.bf16.msra.mxu0 %v409_v7  ;;  %384 = vmatpush3.bf16.msra.mxu1 %v418_v12 }
  0x4a   :  { %365 = vmatprep.subr.bf16.mxu0 %v521_v0  ;;  %385 = vmatprep.subr.bf16.mxu1 %v521_v0 }
  0x4d   :  { %366 = vmatpush3.bf16.msra.mxu0 %v410_v9  ;;  %386 = vmatpush3.bf16.msra.mxu1 %v419_v14 }
  0x4e   :  { %367 = vmatprep.subr.bf16.mxu0 %v521_v0  ;;  %387 = vmatprep.subr.bf16.mxu1 %v521_v0 }
  0x51   :  { %368 = vmatpush3.bf16.msra.mxu0 %v411_v11  ;;  %388 = vmatpush3.bf16.msra.mxu1 %v420_v16 }
  0x52   :  { %369 = vmatprep.subr.bf16.mxu0 %v521_v0  ;;  %389 = vmatprep.subr.bf16.mxu1 %v521_v0 }
  0x55   :  { %370 = vmatpush3.bf16.msra.mxu0 %v412_v13  ;;  %390 = vmatpush3.bf16.msra.mxu1 %v421_v17 }
  0x58   :  { %372 = vmatmul.mubr.bf16.vlgmr.msra.gmra.mrb[0].mxu0 %v413_v15 }
 0x12b   :  { %v176_v19 = vpop.f32.mrb[0].mxu0 }
 0x12c   :  { %v177_v20 = vadd.f32 %v318_v18, %v176_v19  ;;  %v373_v21 = vpop.f32.mrb[1].mxu0 }
 0x12d   :  { %v179_v22 = vpop.f32.mrb[2].mxu0 }
 0x12e   :  { %v180_v23 = vadd.f32 %v318_v18, %v179_v22  ;;  %v374_v24 = vpop.f32.mrb[3].mxu0  ;;  %v183_v25 = vmax.f32 %v177_v20, 0.0 }
 0x130   :  { %v184_v26 = vmax.f32 %v180_v23, 0.0 }
 0x132   :  { %v185_v27 = vpack.c.bf16 %v184_v26, %v183_v25 }
 0x134   :  { %392 = vmatmul.mubr.bf16.vlgmr.msra.gmra.mrb[0].mxu1 %v185_v27 }
 0x207   :  { %v291_v29 = vpop.f32.mrb[0].mxu1 }
 0x208   :  { %v292_v30 = vadd.f32 %v328_v28, %v291_v29  ;;  %v393_v31 = vpop.f32.mrb[1].mxu1 }
 0x209   :  { %v294_v32 = vpop.f32.mrb[2].mxu1 }
 0x20a   :  { %298 = vst [vmem:[#allocation8] sm:$0xff] %v292_v30  ;;  %v295_v33 = vadd.f32 %v328_v28, %v294_v32  ;;  %v394_v34 = vpop.f32.mrb[3].mxu1 }
 0x20c   :  { %299 = vst [vmem:[#allocation8 + $0x8] sm:$0xff] %v295_v33 }
 0x20d   :  { %499 = shalt.err (!%p496_p0)
}
 0x20e   :  { %s500_s10 = scalar_lea.hbm %s631_s5, 256 }
 0x20f   :  { %p501_p1 = scmp.ne.s32.totalorder %s631_s5, %s500_s10  ;;  %p504_p2 = scmp.lt.u32.totalorder %s500_s10, %s631_s5 }
 0x211   :  { %p506_p3 = pnand %p504_p2, %p501_p1 }
 0x213   :  { %509 = shalt.err (!%p506_p3)
}
 0x214   :  { %s524_s15 = smov 128   ;;  %s525_s16 = smov 8  }
 0x215   :  { %311 = dma.vmem_to_hbm [thread:$0]  %s306_s8, 256, %s631_s5, [#allocation4], %s524_s15, %s524_s15, %s525_s16  }
 0x216   :  { %514 = dma.done.wait [#allocation4], 256  }
 0x217   :  { %515 = vsyncadd [#allocation4], 4294967040 }
 0x218   :  { %315 = vsyncpa [#allocation3], 1 }
 0x219   :  { %316 = vsyncpa [#allocation6], 1 }
 0x21a   :  { %317 = vsyncpa [#allocation4], 1 }

// kernel: tpu_custom_call.1
= control target key start
LH: loop header
LB: loop body
LE: loop exit
PB: predicated region body
PF: predicated region fallthrough
CT: control target
= control target key end

     0   :  { %10 = vsyncpa [#allocation3], 0  ;;  %s626_s0 = inlined_call_operand.hbm [shape: bf16[16,128], index: 0, kind: input, shape index: {}]   ;;  %s627_s1 = inlined_call_operand.hbm [shape: bf16[128,128], index: 1, kind: input, shape index: {}]   ;;  %s628_s2 = inlined_call_operand.vmem [shape: f32[1,128], index: 2, kind: input, shape index: {}]   ;;  %s629_s3 = inlined_call_operand.hbm [shape: bf16[128,128], index: 3, kind: input, shape index: {}]   ;;  %s630_s4 = inlined_call_operand.vmem [shape: f32[1,128], index: 4, kind: input, shape index: {}]   ;;  %s631_s5 = inlined_call_operand.hbm [shape: f32[16,128], index: 5, kind: output, shape index: {}]  }
   0x1   :  { %11 = vsyncpa [#allocation6], 0 }
   0x2   :  { %12 = vsyncpa [#allocation4], 0  ;;  %s516_s18 = smov [#allocation5]   ;;  %s517_s20 = smov [#allocation2]  }
   0x3   :  { %s30_s19 = sshll.u32 %s516_s18, 4  ;;  %s18_s21 = sshll.u32 %s517_s20, 4  ;;  %s31_s19 = int_to_ptr.vmem [resolvable:$true] %s30_s19  ;;  %s556_s21 = int_to_ptr.vmem [resolvable:$true] %s18_s21 }
   0x4   :  { %s422_s24 = scalar_lea.hbm %s627_s1, 1024 }
   0x5   :  { %p423_p0 = scmp.ne.s32.totalorder %s627_s1, %s422_s24  ;;  %p426_p1 = scmp.lt.u32.totalorder %s422_s24, %s627_s1 }
   0x7   :  { %p428_p2 = pnand %p426_p1, %p423_p0 }
   0x9   :  { %431 = shalt.err (!%p428_p2)
}
   0xa   :  { %s432_s29 = scalar_lea.vmem %s31_s19, 1024  ;;  %p437_p4 = scmp.lt.s32.totalorder %s31_s19, %s31_s19 }
   0xb   :  { %p433_p3 = scmp.ne.s32.totalorder %s31_s19, %s432_s29  ;;  %p438_p5 = scmp.lt.s32.totalorder %s432_s29, %s432_s29 }
   0xd   :  { %p439_p6 = por %p438_p5, %p437_p4 }
   0xf   :  { %p440_p7 = pnand %p439_p6, %p433_p3 }
  0x11   :  { %443 = shalt.err (!%p440_p7)
}
  0x12   :  { %s518_s30 = smov 64   ;;  %s519_s6 = smov 4  }
  0x13   :  { %36 = dma.hbm_to_vmem [thread:$0]  %s627_s1, 1024, %s31_s19, [#allocation6], %s518_s30, %s518_s30, %s519_s6  }
  0x14   :  { %s444_s11 = scalar_lea.hbm %s626_s0, 128 }
  0x15   :  { %p445_p8 = scmp.ne.s32.totalorder %s626_s0, %s444_s11  ;;  %p448_p9 = scmp.lt.u32.totalorder %s444_s11, %s626_s0 }
  0x17   :  { %p450_p10 = pnand %p448_p9, %p445_p8 }
  0x19   :  { %453 = shalt.err (!%p450_p10)
}
  0x1a   :  { %s454_s16 = scalar_lea.vmem %s556_s21, 128  ;;  %p459_p12 = scmp.lt.s32.totalorder %s556_s21, %s556_s21 }
  0x1b   :  { %p455_p11 = scmp.ne.s32.totalorder %s556_s21, %s454_s16  ;;  %p460_p13 = scmp.lt.s32.totalorder %s454_s16, %s454_s16 }
  0x1d   :  { %p461_p0 = por %p460_p13, %p459_p12 }
  0x1f   :  { %p462_p1 = pnand %p461_p0, %p455_p11 }
  0x21   :  { %465 = shalt.err (!%p462_p1)
}
  0x22   :  { %24 = dma.hbm_to_vmem [thread:$0]  %s626_s0, 128, %s556_s21, [#allocation3], %s518_s30, %s518_s30, %s519_s6  }
  0x23   :  { %s520_s18 = smov [#allocation7]   ;;  %s466_s23 = scalar_lea.hbm %s629_s3, 1024 }
  0x24   :  { %s44_s19 = sshll.u32 %s520_s18, 4  ;;  %p467_p2 = scmp.ne.s32.totalorder %s629_s3, %s466_s23  ;;  %s45_s19 = int_to_ptr.vmem [resolvable:$true] %s44_s19 }
  0x25   :  { %p470_p3 = scmp.lt.u32.totalorder %s466_s23, %s629_s3 }
  0x27   :  { %p472_p4 = pnand %p470_p3, %p467_p2 }
  0x29   :  { %475 = shalt.err (!%p472_p4)
}
  0x2a   :  { %s476_s28 = scalar_lea.vmem %s45_s19, 1024  ;;  %p481_p6 = scmp.lt.s32.totalorder %s45_s19, %s45_s19 }
  0x2b   :  { %p477_p5 = scmp.ne.s32.totalorder %s45_s19, %s476_s28  ;;  %p482_p7 = scmp.lt.s32.totalorder %s476_s28, %s476_s28 }
  0x2d   :  { %p483_p8 = por %p482_p7, %p481_p6 }
  0x2f   :  { %p484_p9 = pnand %p483_p8, %p477_p5 }
  0x31   :  { %487 = shalt.err (!%p484_p9)
}
  0x32   :  { %50 = dma.hbm_to_vmem [thread:$0]  %s629_s3, 1024, %s45_s19, [#allocation6], %s518_s30, %s518_s30, %s519_s6  }
  0x33   :  { %510 = dma.done.wait [#allocation3], 128  }
  0x34   :  { %511 = vsyncadd [#allocation3], 4294967168 }
  0x35   :  { %512 = dma.done.wait [#allocation6], 2048  }
  0x36   :  { %513 = vsyncadd [#allocation6], 4294965248  ;;  %v521_v0 = vmov 0.0   ;;  %vm522_vm0 = vmmov 0   ;;  %v405_v1 = vld [vmem:[#allocation5] sm:$0xff]   ;;  %v406_v2 = vld [vmem:[#allocation5 + $0x8] sm:$0xff]  }
  0x37   :  { %355 = vmatprep.subr.bf16.mxu0 %v521_v0  ;;  %371 = vmatprep.mubr.msk.bf16.mxu0 %vm522_vm0, %v521_v0  ;;  %v407_v3 = vld [vmem:[#allocation5 + $0x10] sm:$0xff]   ;;  %v414_v4 = vld [vmem:[#allocation7] sm:$0xff]   ;;  %v408_v5 = vld [vmem:[#allocation5 + $0x18] sm:$0xff]   ;;  %s523_s7 = smov [#allocation8]  }
  0x38   :  { %375 = vmatprep.subr.bf16.mxu1 %v521_v0  ;;  %391 = vmatprep.mubr.msk.bf16.mxu1 %vm522_vm0, %v521_v0  ;;  %v415_v6 = vld [vmem:[#allocation7 + $0x8] sm:$0xff]   ;;  %v409_v7 = vld [vmem:[#allocation5 + $0x20] sm:$0xff]   ;;  %v416_v8 = vld [vmem:[#allocation7 + $0x10] sm:$0xff]   ;;  %s305_s8 = sshll.u32 %s523_s7, 4  ;;  %s306_s8 = int_to_ptr.vmem [resolvable:$true] %s305_s8 }
  0x39   :  { %356 = vmatpush3.bf16.msra.mxu0 %v405_v1  ;;  %376 = vmatpush3.bf16.msra.mxu1 %v414_v4  ;;  %v410_v9 = vld [vmem:[#allocation5 + $0x28] sm:$0xff]   ;;  %v417_v10 = vld [vmem:[#allocation7 + $0x18] sm:$0xff]   ;;  %v411_v11 = vld [vmem:[#allocation5 + $0x30] sm:$0xff]   ;;  %p493_p11 = scmp.lt.s32.totalorder %s306_s8, %s306_s8 }
  0x3a   :  { %357 = vmatprep.subr.bf16.mxu0 %v521_v0  ;;  %377 = vmatprep.subr.bf16.mxu1 %v521_v0  ;;  %v418_v12 = vld [vmem:[#allocation7 + $0x20] sm:$0xff]   ;;  %v412_v13 = vld [vmem:[#allocation5 + $0x38] sm:$0xff]   ;;  %v419_v14 = vld [vmem:[#allocation7 + $0x28] sm:$0xff]  }
  0x3b   :  { %v413_v15 = vld [vmem:[#allocation2] sm:$0xff]   ;;  %v420_v16 = vld [vmem:[#allocation7 + $0x30] sm:$0xff]  }
  0x3c   :  { %v421_v17 = vld [vmem:[#allocation7 + $0x38] sm:$0xff]  }
  0x3d   :  { %358 = vmatpush3.bf16.msra.mxu0 %v406_v2  ;;  %378 = vmatpush3.bf16.msra.mxu1 %v415_v6  ;;  %v318_v18 = vld [vmem:[%s628_s2] ss:$0 sm:$0xff]  ;;  %s488_s2 = scalar_lea.vmem %s306_s8, 256 }
  0x3e   :  { %359 = vmatprep.subr.bf16.mxu0 %v521_v0  ;;  %379 = vmatprep.subr.bf16.mxu1 %v521_v0  ;;  %v328_v28 = vld [vmem:[%s630_s4] ss:$0 sm:$0xff]  ;;  %p489_p10 = scmp.ne.s32.totalorder %s306_s8, %s488_s2  ;;  %p494_p12 = scmp.lt.s32.totalorder %s488_s2, %s488_s2 }
  0x40   :  { %p495_p13 = por %p494_p12, %p493_p11 }
  0x41   :  { %360 = vmatpush3.bf16.msra.mxu0 %v407_v3  ;;  %380 = vmatpush3.bf16.msra.mxu1 %v416_v8 }
  0x42   :  { %361 = vmatprep.subr.bf16.mxu0 %v521_v0  ;;  %381 = vmatprep.subr.bf16.mxu1 %v521_v0  ;;  %p496_p0 = pnand %p495_p13, %p489_p10 }
  0x45   :  { %362 = vmatpush3.bf16.msra.mxu0 %v408_v5  ;;  %382 = vmatpush3.bf16.msra.mxu1 %v417_v10 }
  0x46   :  { %363 = vmatprep.subr.bf16.mxu0 %v521_v0  ;;  %383 = vmatprep.subr.bf16.mxu1 %v521_v0 }
  0x49   :  { %364 = vmatpush3.bf16.msra.mxu0 %v409_v7  ;;  %384 = vmatpush3.bf16.msra.mxu1 %v418_v12 }
  0x4a   :  { %365 = vmatprep.subr.bf16.mxu0 %v521_v0  ;;  %385 = vmatprep.subr.bf16.mxu1 %v521_v0 }
  0x4d   :  { %366 = vmatpush3.bf16.msra.mxu0 %v410_v9  ;;  %386 = vmatpush3.bf16.msra.mxu1 %v419_v14 }
  0x4e   :  { %367 = vmatprep.subr.bf16.mxu0 %v521_v0  ;;  %387 = vmatprep.subr.bf16.mxu1 %v521_v0 }
  0x51   :  { %368 = vmatpush3.bf16.msra.mxu0 %v411_v11  ;;  %388 = vmatpush3.bf16.msra.mxu1 %v420_v16 }
  0x52   :  { %369 = vmatprep.subr.bf16.mxu0 %v521_v0  ;;  %389 = vmatprep.subr.bf16.mxu1 %v521_v0 }
  0x55   :  { %370 = vmatpush3.bf16.msra.mxu0 %v412_v13  ;;  %390 = vmatpush3.bf16.msra.mxu1 %v421_v17 }
  0x58   :  { %372 = vmatmul.mubr.bf16.vlgmr.msra.gmra.mrb[0].mxu0 %v413_v15 }
 0x12b   :  { %v176_v19 = vpop.f32.mrb[0].mxu0 }
 0x12c   :  { %v177_v20 = vadd.f32 %v318_v18, %v176_v19  ;;  %v373_v21 = vpop.f32.mrb[1].mxu0 }
 0x12d   :  { %v179_v22 = vpop.f32.mrb[2].mxu0 }
 0x12e   :  { %v180_v23 = vadd.f32 %v318_v18, %v179_v22  ;;  %v374_v24 = vpop.f32.mrb[3].mxu0  ;;  %v183_v25 = vmax.f32 %v177_v20, 0.0 }
 0x130   :  { %v184_v26 = vmax.f32 %v180_v23, 0.0 }
 0x132   :  { %v185_v27 = vpack.c.bf16 %v184_v26, %v183_v25 }
 0x134   :  { %392 = vmatmul.mubr.bf16.vlgmr.msra.gmra.mrb[0].mxu1 %v185_v27 }
 0x207   :  { %v291_v29 = vpop.f32.mrb[0].mxu1 }
 0x208   :  { %v292_v30 = vadd.f32 %v328_v28, %v291_v29  ;;  %v393_v31 = vpop.f32.mrb[1].mxu1 }
 0x209   :  { %v294_v32 = vpop.f32.mrb[2].mxu1 }
 0x20a   :  { %298 = vst [vmem:[#allocation8] sm:$0xff] %v292_v30  ;;  %v295_v33 = vadd.f32 %v328_v28, %v294_v32  ;;  %v394_v34 = vpop.f32.mrb[3].mxu1 }
 0x20c   :  { %299 = vst [vmem:[#allocation8 + $0x8] sm:$0xff] %v295_v33 }
 0x20d   :  { %499 = shalt.err (!%p496_p0)
}
 0x20e   :  { %s500_s10 = scalar_lea.hbm %s631_s5, 256 }
 0x20f   :  { %p501_p1 = scmp.ne.s32.totalorder %s631_s5, %s500_s10  ;;  %p504_p2 = scmp.lt.u32.totalorder %s500_s10, %s631_s5 }
 0x211   :  { %p506_p3 = pnand %p504_p2, %p501_p1 }
 0x213   :  { %509 = shalt.err (!%p506_p3)
}
 0x214   :  { %s524_s15 = smov 128   ;;  %s525_s16 = smov 8  }
 0x215   :  { %311 = dma.vmem_to_hbm [thread:$0]  %s306_s8, 256, %s631_s5, [#allocation4], %s524_s15, %s524_s15, %s525_s16  }
 0x216   :  { %514 = dma.done.wait [#allocation4], 256  }
 0x217   :  { %515 = vsyncadd [#allocation4], 4294967040 }
 0x218   :  { %315 = vsyncpa [#allocation3], 1 }
 0x219   :  { %316 = vsyncpa [#allocation6], 1 }
 0x21a   :  { %317 = vsyncpa [#allocation4], 1 }

</bundles_post_ra>
